<compile_context>
chip_gen: v7x
topology: tpu7x:2x2x1
jax: 0.10.0
libtpu: 0.0.40
codegen_flags: <defaults>
</compile_context>

<pallas_src>
import jax
import jax.numpy as jnp
from jax.experimental import pallas as pl
from jax.experimental.pallas import tpu as pltpu


def _round_up(x, m):
    return ((x + m - 1) // m) * m


def _pick_tile(dim, max_tile, quantum):
    """Largest tile <= max_tile that is a multiple of `quantum` and divides `dim`.

    `dim` must already be a multiple of `quantum`.
    """
    if dim <= max_tile:
        return dim
    best = quantum
    t = quantum
    while t <= max_tile:
        if dim % t == 0:
            best = t
        t += quantum
    return best


def _vmem_cap_bytes():
    """Generation-aware scoped-VMEM cap with headroom for Mosaic scratch."""
    try:
        cap = int(pltpu.get_tpu_info().vmem_capacity_bytes)
    except Exception:
        cap = 64 * 1024 * 1024  # conservative (v7x-sized) fallback
    return max(32 * 1024 * 1024, cap * 3 // 4)


def _bayes_linear_kernel(x_ref, wmu_ref, wvar_ref, bias_ref, zs_ref,
                         out_ref, gamma_acc, delta_acc):
    k = pl.program_id(2)

    @pl.when(k == 0)
    def _init():
        gamma_acc[...] = jnp.zeros_like(gamma_acc)
        delta_acc[...] = jnp.zeros_like(delta_acc)

    x = x_ref[...]
    # Square in f32 (native VPU path on v5e, avoids double rounding of x), then
    # feed the MXU in the (possibly bf16) matmul dtype with f32 accumulation.
    xsq = jnp.square(x.astype(jnp.float32)).astype(wvar_ref.dtype)
    gamma_acc[...] += jnp.dot(x, wmu_ref[...],
                              preferred_element_type=jnp.float32)
    delta_acc[...] += jnp.dot(xsq, wvar_ref[...],
                              preferred_element_type=jnp.float32)

    @pl.when(k == pl.num_programs(2) - 1)
    def _finalize():
        bias = bias_ref[...].astype(jnp.float32)     # (2, bn): [b_mu; b_var]
        gamma = gamma_acc[...] + bias[0:1, :]
        delta = jnp.maximum(delta_acc[...] + bias[1:2, :], 0.0)
        # zs_ref already holds zeta * weight_out (hoisted out of the kernel).
        r = gamma + jnp.sqrt(delta) * zs_ref[...].astype(jnp.float32)
        out_ref[...] = r.astype(out_ref.dtype)


def prepare_bayesian_linear_params(w_mu, w_var, b_mu, b_var, *,
                                   block_n=512, block_k=512,
                                   matmul_dtype=jnp.bfloat16):
    """Pad + cast the (fan_in, fan_out) weights ONCE (not per forward call)."""
    fan_in, fan_out = w_mu.shape

    Np = _round_up(fan_out, 128)
    bn = _pick_tile(Np, block_n, 128)

    Kp8 = _round_up(fan_in, 8)
    if Kp8 <= block_k:
        # Small fan_in: pad K only to a multiple of 8 and take the whole K in
        # one step; block dims equal the full padded array dims, so the (8,128)
        # rule is satisfied without streaming 128-padded zero weight rows.
        Kp, bk = Kp8, Kp8
    else:
        Kp = _round_up(fan_in, 128)
        bk = _pick_tile(Kp, block_k, 128)

    pad_kn = ((0, Kp - fan_in), (0, Np - fan_out))
    w_mu_p = jnp.pad(w_mu.astype(matmul_dtype), pad_kn)
    w_var_p = jnp.pad(w_var.astype(matmul_dtype), pad_kn)
    bias_p = jnp.pad(
        jnp.stack([b_mu.astype(jnp.float32), b_var.astype(jnp.float32)], axis=0),
        ((0, 0), (0, Np - fan_out)))

    return dict(w_mu=w_mu_p, w_var=w_var_p, bias=bias_p,
                fan_in=fan_in, fan_out=fan_out,
                Kp=Kp, Np=Np, bk=bk, bn=bn,
                matmul_dtype=matmul_dtype)


def bayesian_linear_forward(x, zeta, params, *, weight_out=0.1,
                            block_batch=1024):
    """x: (B, fan_in), zeta: (fan_out,), params from prepare_* -> (B, fan_out)."""
    B, fan_in = x.shape
    assert fan_in == params["fan_in"]
    fan_out = params["fan_out"]
    Kp, Np, bk, bn = params["Kp"], params["Np"], params["bk"], params["bn"]
    matmul_dtype = params["matmul_dtype"]
    out_dtype = x.dtype

    in_itm = jnp.dtype(matmul_dtype).itemsize
    out_itm = jnp.dtype(out_dtype).itemsize

    Bp = _round_up(B, 8)
    bm = _pick_tile(Bp, block_batch, 8)
    # v7x megacore: if fan_out fits in one N tile, split the batch so at least
    # one "parallel" grid axis has >= 2 iterations (no effect on v5e/v6e).
    if (Np // bn) == 1 and (Bp // bm) == 1 and Bp >= 16:
        bm = _pick_tile(Bp, max(8, bm // 2), 8)

    cap = _vmem_cap_bytes()

    def est_vmem(bm_):
        return (2 * (bm_ * bk * in_itm           # X tile (double-buffered)
                     + 2 * bk * bn * in_itm      # W_mu / W_var tiles
                     + 3 * 8 * bn * 4            # bias + zeta (sublane-padded)
                     + bm_ * bn * out_itm)       # output tile
                + 2 * bm_ * bn * 4)              # gamma / delta accumulators

    # Scale the batch tile down rather than failing to compile.
    while est_vmem(bm) > cap and bm > 8:
        new_bm = _pick_tile(Bp, max(8, bm // 2), 8)
        if new_bm == bm:
            break
        bm = new_bm

    vmem_limit = int(min(max(est_vmem(bm) * 5 // 4 + (2 << 20), 32 << 20), cap))

    # Only X (and the tiny zeta vector) are padded / cast per call.
    xp = jnp.pad(x, ((0, Bp - B), (0, Kp - fan_in))).astype(matmul_dtype)
    zs = jnp.pad(zeta.reshape(1, fan_out).astype(jnp.float32)
                 * jnp.float32(weight_out),
                 ((0, 0), (0, Np - fan_out)))

    grid = (Bp // bm, Np // bn, Kp // bk)

    out_padded = pl.pallas_call(
        _bayes_linear_kernel,
        out_shape=jax.ShapeDtypeStruct((Bp, Np), out_dtype),
        grid_spec=pltpu.PrefetchScalarGridSpec(
            num_scalar_prefetch=0,
            grid=grid,
            in_specs=[
                pl.BlockSpec((bm, bk), lambda i, j, k: (i, k)),   # X tile
                pl.BlockSpec((bk, bn), lambda i, j, k: (k, j)),   # W_mu tile
                pl.BlockSpec((bk, bn), lambda i, j, k: (k, j)),   # W_var tile
                pl.BlockSpec((2, bn), lambda i, j, k: (0, j)),    # [b_mu; b_var]
                pl.BlockSpec((1, bn), lambda i, j, k: (0, j)),    # zeta*weight_out
            ],
            out_specs=pl.BlockSpec((bm, bn), lambda i, j, k: (i, j)),
            scratch_shapes=[pltpu.VMEM((bm, bn), jnp.float32),    # gamma acc
                            pltpu.VMEM((bm, bn), jnp.float32)],   # delta acc
        ),
        compiler_params=pltpu.CompilerParams(
            dimension_semantics=("parallel", "parallel", "arbitrary"),
            vmem_limit_bytes=vmem_limit),
    )(xp, params["w_mu"], params["w_var"], params["bias"], zs)

    return out_padded[:B, :fan_out]


def _rho2var(rho):
    # torch: log(1 + exp(rho)) ** 2  (softplus squared)
    return jnp.square(jnp.log1p(jnp.exp(rho)))


if __name__ == "__main__":
    fan_in, fan_out, batch = 32, 64, 16
    weight_out = 0.1

    key = jax.random.PRNGKey(0)
    k_wmu, k_bmu, k_x, k_zeta = jax.random.split(key, 4)

    # __init__-style deterministic parameter construction.
    W_mu = jax.random.normal(k_wmu, (fan_in, fan_out), dtype=jnp.float32)
    W_rho = jnp.log(jnp.exp(jnp.full((fan_in, fan_out), 0.5, jnp.float32)) - 1.0)
    b_mu = jax.random.normal(k_bmu, (fan_out,), dtype=jnp.float32)
    b_rho = jnp.log(jnp.exp(jnp.full((fan_out,), 0.5, jnp.float32)) - 1.0)
    W_var = _rho2var(W_rho)
    b_var = _rho2var(b_rho)

    # Inputs and the shared noise sample (share_paremeters_among_samples=True).
    # TODO(synk): zeta sampling, the deterministic / per-sample-zeta branches and
    # the set/get/save_old_params bookkeeping stay host-side in JAX; only the
    # shared-zeta stochastic forward math runs in the Pallas kernel.
    x = jax.random.normal(k_x, (batch, fan_in), dtype=jnp.float32)
    zeta = jax.random.normal(k_zeta, (fan_out,), dtype=jnp.float32)

    # Pure-JAX f32 reference of the same forward.
    gamma_ref = x @ W_mu + b_mu
    delta_ref = (x ** 2) @ W_var + b_var
    r_ref = gamma_ref + jnp.sqrt(delta_ref) * zeta[None, :] * weight_out

    # Default path: bf16 MXU operands, f32 accumulation (loose tolerance vs f32).
    params_bf16 = prepare_bayesian_linear_params(W_mu, W_var, b_mu, b_var)
    r_bf16 = jax.block_until_ready(
        bayesian_linear_forward(x, zeta, params_bf16, weight_out=weight_out))
    assert r_bf16.shape == (batch, fan_out)
    assert jnp.allclose(r_bf16, r_ref, atol=1e-1, rtol=5e-2)

    # f32-operand path: tight structural check against the f32 reference.
    params_f32 = prepare_bayesian_linear_params(W_mu, W_var, b_mu, b_var,
                                                matmul_dtype=jnp.float32)
    r_f32 = jax.block_until_ready(
        bayesian_linear_forward(x, zeta, params_f32, weight_out=weight_out))
    assert jnp.allclose(r_f32, r_ref, atol=1e-4, rtol=1e-4)

    print("KERNEL_OK")
</pallas_src>

<mosaic_0001>
module attributes {stable_mosaic.version = 11 : i64} {
  func.func @_bayes_linear_kernel(%arg0: i32, %arg1: i32, %arg2: i32, %arg3: memref<8x32xbf16, #tpu.memory_space<vmem>>, %arg4: memref<32x128xbf16, #tpu.memory_space<vmem>>, %arg5: memref<32x128xbf16, #tpu.memory_space<vmem>>, %arg6: memref<2x128xf32, #tpu.memory_space<vmem>>, %arg7: memref<1x128xf32, #tpu.memory_space<vmem>>, %arg8: memref<8x128xf32, #tpu.memory_space<vmem>>, %arg9: memref<8x128xf32, #tpu.memory_space<vmem>>, %arg10: memref<8x128xf32, #tpu.memory_space<vmem>>) attributes {dimension_semantics = [#tpu.dimension_semantics<parallel>, #tpu.dimension_semantics<parallel>, #tpu.dimension_semantics<arbitrary>], iteration_bounds = array<i64: 2, 1, 1>, scalar_prefetch = 0 : i64, scratch_operands = 2 : i64, tpu.core_type = #tpu.core_type<tc>, window_params = [{transform_indices = @transform_0, window_bounds = array<i64: 8, 32>}, {transform_indices = @transform_1, window_bounds = array<i64: 32, 128>}, {transform_indices = @transform_2, window_bounds = array<i64: 32, 128>}, {transform_indices = @transform_3, window_bounds = array<i64: 2, 128>}, {transform_indices = @transform_4, window_bounds = array<i64: 1, 128>}, {transform_indices = @transform_5, window_bounds = array<i64: 8, 128>}]} {
    %c0_i32 = arith.constant 0 : i32
    %0 = arith.cmpi eq, %arg2, %c0_i32 : i32
    %1 = arith.extui %0 : i1 to i32
    %c0_i32_0 = arith.constant 0 : i32
    %2 = arith.cmpi ne, %1, %c0_i32_0 : i32
    scf.if %2 {
      %cst_17 = arith.constant 0.000000e+00 : f32
      %20 = vector.broadcast %cst_17 : f32 to vector<8x128xf32>
      %c0_18 = arith.constant 0 : index
      %c0_19 = arith.constant 0 : index
      %21 = vector.load %arg9[%c0_18, %c0_19] : memref<8x128xf32, #tpu.memory_space<vmem>>, vector<8x128xf32>
      tpu.vector_store %arg9[%c0_18, %c0_19], %20 {strides = array<i32>} : memref<8x128xf32, #tpu.memory_space<vmem>>, vector<8x128xf32>,
      %cst_20 = arith.constant 0.000000e+00 : f32
      %22 = vector.broadcast %cst_20 : f32 to vector<8x128xf32>
      %c0_21 = arith.constant 0 : index
      %c0_22 = arith.constant 0 : index
      %23 = vector.load %arg10[%c0_21, %c0_22] : memref<8x128xf32, #tpu.memory_space<vmem>>, vector<8x128xf32>
      tpu.vector_store %arg10[%c0_21, %c0_22], %22 {strides = array<i32>} : memref<8x128xf32, #tpu.memory_space<vmem>>, vector<8x128xf32>,
    } else {
    }
    %c0 = arith.constant 0 : index
    %c0_1 = arith.constant 0 : index
    %3 = vector.load %arg3[%c0, %c0_1] : memref<8x32xbf16, #tpu.memory_space<vmem>>, vector<8x32xbf16>
    %4 = arith.extf %3 : vector<8x32xbf16> to vector<8x32xf32>
    %5 = arith.mulf %4, %4 : vector<8x32xf32>
    %6 = arith.truncf %5 : vector<8x32xf32> to vector<8x32xbf16>
    %c0_2 = arith.constant 0 : index
    %c0_3 = arith.constant 0 : index
    %7 = vector.load %arg9[%c0_2, %c0_3] : memref<8x128xf32, #tpu.memory_space<vmem>>, vector<8x128xf32>
    %c0_4 = arith.constant 0 : index
    %c0_5 = arith.constant 0 : index
    %8 = vector.load %arg4[%c0_4, %c0_5] : memref<32x128xbf16, #tpu.memory_space<vmem>>, vector<32x128xbf16>
    %cst = arith.constant dense<0.000000e+00> : vector<8x128xf32>
    %9 = tpu.matmul %3, %8, %cst {dimension_numbers = #tpu.dot_dimension_numbers<[1], [0], [0], [1], [0, 0, 1, 1], [], []>} : vector<8x32xbf16>, vector<32x128xbf16>, vector<8x128xf32> -> vector<8x128xf32>
    %10 = arith.addf %7, %9 : vector<8x128xf32>
    %c0_6 = arith.constant 0 : index
    %c0_7 = arith.constant 0 : index
    %11 = vector.load %arg9[%c0_6, %c0_7] : memref<8x128xf32, #tpu.memory_space<vmem>>, vector<8x128xf32>
    tpu.vector_store %arg9[%c0_6, %c0_7], %10 {strides = array<i32>} : memref<8x128xf32, #tpu.memory_space<vmem>>, vector<8x128xf32>,
    %c0_8 = arith.constant 0 : index
    %c0_9 = arith.constant 0 : index
    %12 = vector.load %arg10[%c0_8, %c0_9] : memref<8x128xf32, #tpu.memory_space<vmem>>, vector<8x128xf32>
    %c0_10 = arith.constant 0 : index
    %c0_11 = arith.constant 0 : index
    %13 = vector.load %arg5[%c0_10, %c0_11] : memref<32x128xbf16, #tpu.memory_space<vmem>>, vector<32x128xbf16>
    %cst_12 = arith.constant dense<0.000000e+00> : vector<8x128xf32>
    %14 = tpu.matmul %6, %13, %cst_12 {dimension_numbers = #tpu.dot_dimension_numbers<[1], [0], [0], [1], [0, 0, 1, 1], [], []>} : vector<8x32xbf16>, vector<32x128xbf16>, vector<8x128xf32> -> vector<8x128xf32>
    %15 = arith.addf %12, %14 : vector<8x128xf32>
    %c0_13 = arith.constant 0 : index
    %c0_14 = arith.constant 0 : index
    %16 = vector.load %arg10[%c0_13, %c0_14] : memref<8x128xf32, #tpu.memory_space<vmem>>, vector<8x128xf32>
    tpu.vector_store %arg10[%c0_13, %c0_14], %15 {strides = array<i32>} : memref<8x128xf32, #tpu.memory_space<vmem>>, vector<8x128xf32>,
    %c0_i32_15 = arith.constant 0 : i32
    %17 = arith.cmpi eq, %arg2, %c0_i32_15 : i32
    %18 = arith.extui %17 : i1 to i32
    %c0_i32_16 = arith.constant 0 : i32
    %19 = arith.cmpi ne, %18, %c0_i32_16 : i32
    scf.if %19 {
      %c0_17 = arith.constant 0 : index
      %c0_18 = arith.constant 0 : index
      %20 = vector.load %arg6[%c0_17, %c0_18] : memref<2x128xf32, #tpu.memory_space<vmem>>, vector<2x128xf32>
      %c0_19 = arith.constant 0 : index
      %c0_20 = arith.constant 0 : index
      %21 = vector.load %arg9[%c0_19, %c0_20] : memref<8x128xf32, #tpu.memory_space<vmem>>, vector<8x128xf32>
      %22 = vector.extract_strided_slice %20 {offsets = [0, 0], sizes = [1, 128], strides = [1, 1]} : vector<2x128xf32> to vector<1x128xf32>
      %23 = vector.broadcast %22 : vector<1x128xf32> to vector<8x128xf32>
      %24 = arith.addf %21, %23 : vector<8x128xf32>
      %c0_21 = arith.constant 0 : index
      %c0_22 = arith.constant 0 : index
      %25 = vector.load %arg10[%c0_21, %c0_22] : memref<8x128xf32, #tpu.memory_space<vmem>>, vector<8x128xf32>
      %26 = vector.extract_strided_slice %20 {offsets = [1, 0], sizes = [1, 128], strides = [1, 1]} : vector<2x128xf32> to vector<1x128xf32>
      %27 = vector.broadcast %26 : vector<1x128xf32> to vector<8x128xf32>
      %28 = arith.addf %25, %27 : vector<8x128xf32>
      %cst_23 = arith.constant 0.000000e+00 : f32
      %29 = vector.broadcast %cst_23 : f32 to vector<8x128xf32>
      %30 = arith.maximumf %28, %29 : vector<8x128xf32>
      %31 = math.sqrt %30 : vector<8x128xf32>
      %c0_24 = arith.constant 0 : index
      %c0_25 = arith.constant 0 : index
      %32 = vector.load %arg7[%c0_24, %c0_25] : memref<1x128xf32, #tpu.memory_space<vmem>>, vector<1x128xf32>
      %33 = vector.broadcast %32 : vector<1x128xf32> to vector<8x128xf32>
      %34 = arith.mulf %31, %33 : vector<8x128xf32>
      %35 = arith.addf %24, %34 : vector<8x128xf32>
      %c0_26 = arith.constant 0 : index
      %c0_27 = arith.constant 0 : index
      %36 = vector.load %arg8[%c0_26, %c0_27] : memref<8x128xf32, #tpu.memory_space<vmem>>, vector<8x128xf32>
      tpu.vector_store %arg8[%c0_26, %c0_27], %35 {strides = array<i32>} : memref<8x128xf32, #tpu.memory_space<vmem>>, vector<8x128xf32>,
    } else {
    }
    return
  }
  func.func @transform_0(%arg0: i32, %arg1: i32, %arg2: i32) -> (i32, i32) {
    %c0_i32 = arith.constant 0 : i32
    return %arg0, %arg2 : i32, i32
  }
  func.func @transform_1(%arg0: i32, %arg1: i32, %arg2: i32) -> (i32, i32) {
    %c0_i32 = arith.constant 0 : i32
    return %arg2, %arg1 : i32, i32
  }
  func.func @transform_2(%arg0: i32, %arg1: i32, %arg2: i32) -> (i32, i32) {
    %c0_i32 = arith.constant 0 : i32
    return %arg2, %arg1 : i32, i32
  }
  func.func @transform_3(%arg0: i32, %arg1: i32, %arg2: i32) -> (i32, i32) {
    %c0_i32 = arith.constant 0 : i32
    %c0_i32_0 = arith.constant 0 : i32
    return %c0_i32, %arg1 : i32, i32
  }
  func.func @transform_4(%arg0: i32, %arg1: i32, %arg2: i32) -> (i32, i32) {
    %c0_i32 = arith.constant 0 : i32
    %c0_i32_0 = arith.constant 0 : i32
    return %c0_i32, %arg1 : i32, i32
  }
  func.func @transform_5(%arg0: i32, %arg1: i32, %arg2: i32) -> (i32, i32) {
    %c0_i32 = arith.constant 0 : i32
    return %arg0, %arg1 : i32, i32
  }
}

</mosaic_0001>

<bundles_post_ra>
// kernel: tpu_custom_call.1
= control target key start
LH: loop header
LB: loop body
LE: loop exit
PB: predicated region body
PF: predicated region fallthrough
CT: control target
= control target key end

     0   :  { %10 = vsyncpa [#allocation5], 0  ;;  %s1280_s0 = inlined_call_operand.hbm [shape: bf16[16,32], index: 0, kind: input, shape index: {}]   ;;  %s1281_s1 = inlined_call_operand.hbm [shape: bf16[32,128], index: 1, kind: input, shape index: {}]   ;;  %s1282_s2 = inlined_call_operand.hbm [shape: bf16[32,128], index: 2, kind: input, shape index: {}]   ;;  %s1283_s3 = inlined_call_operand.vmem [shape: f32[2,128], index: 3, kind: input, shape index: {}]   ;;  %s1284_s4 = inlined_call_operand.vmem [shape: f32[1,128], index: 4, kind: input, shape index: {}]   ;;  %s1285_s5 = inlined_call_operand.hbm [shape: f32[16,128], index: 5, kind: output, shape index: {}]  }
   0x1   :  { %12 = vsyncpa [#allocation5 + $0x1], 0 }
   0x2   :  { %13 = vsyncpa [#allocation8], 0 }
   0x3   :  { %14 = vsyncpa [#allocation6], 0 }
   0x4   :  { %16 = vsyncpa [#allocation6 + $0x1], 0  ;;  %s1023_s18 = smov 0   ;;  %s1025_s19 = smov 0  }
   0x5   :  { %s1027_s20 = smov 0   ;;  %s1029_s21 = smov 0  }
   0x6   :  { %s1031_s22 = smov 0   ;;  %s1033_s23 = smov 0  }
   0x7 LB: > { %s670_s24 = sadd.s32 4294967295, %s983_s23   ;;  %s671_s25 = sadd.s32 4294967294, %s983_s23   ;;  %s983_s23 = sphi %s1033_s23, %s22_s23   ;;  %s979_s22 = sphi %s1031_s22, %s1307_s22   ;;  %s975_s21 = sphi %s1029_s21, %s1306_s21   ;;  %s971_s20 = sphi %s1027_s20, %s1305_s20   ;;  %s967_s19 = sphi %s1025_s19, %s1304_s19   ;;  %s963_s18 = sphi %s1023_s18, %s1303_s18  }
   0x8   : > { %p63_p0 = scmp.ne.s32.totalorder %s967_s19, %s963_s18  ;;  %p1057_p1 = scmp.eq.s32.totalorder %s670_s24, 0 }
   0x9   : > { %p1061_p2 = scmp.eq.s32.totalorder %s670_s24, 1  ;;  %p203_p3 = scmp.eq.s32.totalorder %s671_s25, 1 }
   0xa   : > { %s1290_s26 = scalar_select %p1057_p1, 1, 0 }
   0xb   : > { %p1067_p4 = por %p1057_p1, %p63_p0  ;;  %p672_p5 = scmp.ge.s32.totalorder %s983_s23, 1 }
   0xc   : > { %p1072_p6 = por %p203_p3, %p63_p0  ;;  %p210_p7 = scmp.lt.s32.totalorder %s983_s23, 3 }
   0xd   : > { %s1292_s28 = scalar_select %p1067_p4, 1, 0 }
   0xe   : > { %s1293_s29 = scalar_select %p1072_p6, 1, 0 }
   0xf   : > { %p1077_p8 = pnand %p672_p5, %p210_p7  ;;  %s985_s6 = smov [#allocation7]  }
  0x10   : > { %s226_s7 = sshll.u32 %s985_s6, 4  ;;  %s986_s9 = smov [#allocation9]   ;;  %s1081_s7 = int_to_ptr.vmem [resolvable:$true] %s226_s7 }
  0x11   : > { %p730_p9 = pneg %p1077_p8  ;;  %s243_s10 = sshll.u32 %s986_s9, 4  ;;  %s1092_s10 = int_to_ptr.vmem [resolvable:$true] %s243_s10 }
  0x12   : > { %s811_s13 = scalar_lea.hbm %s1281_s1, 256 }
  0x13   : > { %p1088_p11 = pnand %p730_p9, %p1057_p1  ;;  %p812_p12 = scmp.ne.s32.totalorder %s1281_s1, %s811_s13 }
  0x14   : > { %p818_p5 = scmp.lt.u32.totalorder %s811_s13, %s1281_s1 }
  0x15   : > { %p813_p13 = pneg %p1088_p11 }
  0x17   : > { %p814_p0 = pnand %p813_p13, %p812_p12 }
  0x19   : > { %p815_p3 = pneg %p814_p0 }
  0x1b   : > { %p820_p7 = pnand %p818_p5, %p815_p3 }
  0x1d   : > { %823 = shalt.err (!%p820_p7)
}
  0x1e   : > { %s824_s24 = scalar_lea.vmem %s1081_s7, 256  ;;  %p832_p1 = scmp.lt.s32.totalorder %s1081_s7, %s1081_s7 }
  0x1f   : > { %p825_p9 = scmp.ne.s32.totalorder %s1081_s7, %s824_s24  ;;  %p833_p12 = scmp.lt.s32.totalorder %s824_s24, %s824_s24 }
  0x21   : > { %p827_p10 = pnand %p825_p9, %p813_p13  ;;  %p834_p0 = por %p833_p12, %p832_p1 }
  0x23   : > { %p828_p6 = pneg %p827_p10 }
  0x25   : > { %p835_p4 = pnand %p834_p0, %p828_p6 }
  0x27   : > { %838 = shalt.err (!%p835_p4)
}
  0x28   : > { %s987_s25 = smov 64   ;;  %s988_s6 = smov 4  }
  0x29   : > { %733 = dma.hbm_to_vmem [thread:$0]  (!%p1088_p11), %s1281_s1, 256, %s1081_s7, [#allocation8], %s987_s25, %s987_s25, %s988_s6  }
  0x2a   : > { %s839_s14 = scalar_lea.hbm %s1282_s2, 256 }
  0x2b   : > { %p840_p1 = scmp.ne.s32.totalorder %s1282_s2, %s839_s14  ;;  %p846_p10 = scmp.lt.u32.totalorder %s839_s14, %s1282_s2 }
  0x2d   : > { %p842_p4 = pnand %p840_p1, %p813_p13 }
  0x2f   : > { %p843_p6 = pneg %p842_p4 }
  0x31   : > { %p848_p3 = pnand %p846_p10, %p843_p6 }
  0x33   : > { %851 = shalt.err (!%p848_p3)
}
  0x34   : > { %s852_s7 = scalar_lea.vmem %s1092_s10, 256  ;;  %p860_p12 = scmp.lt.s32.totalorder %s1092_s10, %s1092_s10 }
  0x35   : > { %p853_p5 = scmp.ne.s32.totalorder %s1092_s10, %s852_s7  ;;  %p861_p0 = scmp.lt.s32.totalorder %s852_s7, %s852_s7 }
  0x37   : > { %p855_p7 = pnand %p853_p5, %p813_p13  ;;  %p862_p1 = por %p861_p0, %p860_p12 }
  0x39   : > { %p856_p9 = pneg %p855_p7 }
  0x3b   : > { %p863_p4 = pnand %p862_p1, %p856_p9 }
  0x3d   : > { %866 = shalt.err (!%p863_p4)
}
  0x3e   : > { %736 = dma.hbm_to_vmem [thread:$0]  (!%p1088_p11), %s1282_s2, 256, %s1092_s10, [#allocation8], %s987_s25, %s987_s25, %s988_s6  }
  0x3f   : > { %s41_s12 = sadd.s32 1, %s979_s22  ;;  %s50_s13 = sadd.s32 1, %s971_s20 }
  0x40   : > { %p43_p13 = scmp.ge.s32.totalorder %s41_s12, 2  ;;  %p57_p6 = scmp.ne.s32.totalorder %s971_s20, %s967_s19 }
  0x41   : > { %p58_p10 = scmp.eq.s32.totalorder %s983_s23, 0  ;;  %p747_p3 = scmp.lt.s32.totalorder %s983_s23, 2 }
  0x42   : > { %s1309_s12 = smov (%p43_p13, %s41_s12), 0  ;;  %p1156_p7 = por %p1061_p2, %p57_p6 }
  0x43   : > { %p59_p5 = por %p58_p10, %p57_p6  ;;  %s45_s14 = ssub.s32 %s979_s22, %s1309_s12 }
  0x44   : > { %s1296_s8 = scalar_select %p1156_p7, 1, 0 }
  0x45   : > { %s270_s15 = sand.u32 1, %s971_s20   ;;  %p48_p9 = scmp.eq.s32.totalorder %s45_s14, 0 }
  0x46   : > { %s678_s10 = sshll.u32 %s270_s15, 2  ;;  %s679_s25 = sshll.u32 %s979_s22, 6 }
  0x47   : > { %s1165_s6 = scalar_select %p48_p9, %s971_s20, %s50_s13  }
  0x48   : > { %s1170_s24 = scalar_lea.hbm %s1280_s0, %s679_s25  ;;  %s274_s27 = scalar_lea.vmem [#allocation4], %s678_s10 }
  0x49   : > { %s282_s7 = sshll.u32 %s274_s27, 4  ;;  %p1174_p2 = pnand %p747_p3, %p59_p5  ;;  %s1178_s7 = int_to_ptr.vmem [resolvable:$true] %s282_s7 }
  0x4a   : > { %s271_s11 = scalar_lea.sflag [#allocation5], %s270_s15  ;;  %s867_s13 = scalar_lea.hbm %s1170_s24, 64 }
  0x4b   : > { %p868_p11 = scmp.ne.s32.totalorder %s1170_s24, %s867_s13  ;;  %p869_p12 = pneg %p1174_p2 }
  0x4c   : > { %s872_s25 = scalar_lea.hbm %s1280_s0, 128  ;;  %p873_p4 = scmp.lt.u32.totalorder %s1170_s24, %s1280_s0 }
  0x4d   : > { %p870_p0 = pnand %p869_p12, %p868_p11  ;;  %p874_p13 = scmp.lt.u32.totalorder %s872_s25, %s867_s13 }
  0x4e   : > { %p876_p10 = scmp.lt.u32.totalorder %s867_s13, %s1170_s24 }
  0x4f   : > { %p871_p1 = pneg %p870_p0  ;;  %p875_p6 = por %p874_p13, %p873_p4 }
  0x51   : > { %p877_p3 = por %p876_p10, %p875_p6 }
  0x53   : > { %p878_p5 = pnand %p877_p3, %p871_p1 }
  0x55   : > { %881 = shalt.err (!%p878_p5)
}
  0x56   : > { %s882_s15 = scalar_lea.vmem %s1178_s7, 64  ;;  %s989_s27 = smov [#allocation4]  }
  0x57   : > { %p883_p9 = scmp.ne.s32.totalorder %s1178_s7, %s882_s15  ;;  %s887_s14 = sshll.u32 %s989_s27, 4  ;;  %s888_s14 = int_to_ptr.vmem [resolvable:$false] %s887_s14 }
  0x58   : > { %s889_s10 = scalar_lea.vmem %s888_s14, 128  ;;  %p890_p7 = scmp.lt.s32.totalorder %s1178_s7, %s888_s14 }
  0x59   : > { %p885_p11 = pnand %p883_p9, %p869_p12  ;;  %p891_p4 = scmp.lt.s32.totalorder %s889_s10, %s882_s15 }
  0x5b   : > { %p886_p0 = pneg %p885_p11  ;;  %p892_p13 = por %p891_p4, %p890_p7 }
  0x5d   : > { %p893_p6 = pnand %p892_p13, %p886_p0 }
  0x5f   : > { %896 = shalt.err (!%p893_p6)
}
  0x60   : > { %740 = dma.hbm_to_vmem [thread:$0]  (!%p1174_p2), %s1170_s24, 64, %s1178_s7, %s271_s11  }
  0x61   : > { %291 = sbr.rel (%p1077_p8) target bundleno = 367 (0x16f), region = 40  ;;  %s1208_s13 = sand.u32 (!%p1077_p8), 1, %s967_s19  }
  0x62   : > { %s681_s25 = sshll.u32 (!%p1077_p8), %s1208_s13, 2  ;;  %s294_s16 = scalar_lea.sflag (!%p1077_p8), [#allocation5], %s1208_s13 }
  0x63   : > { %s297_s17 = scalar_lea.vmem (!%p1077_p8), [#allocation4], %s681_s25  ;;  %p1298_p7 = scmp.ne.s32.totalorder (!%p1077_p8), %s1292_s28, 0 }
  0x68   : > { %950 = dma.done.wait (%p1298_p7), %s294_s16, 64  }
  0x69   : > { %952 = vsyncadd (%p1298_p7), %s294_s16, 4294967232  ;;  %p1299_p12 = scmp.ne.s32.totalorder %s1290_s26, 0 }
  0x6b   : > { %954 = dma.done.wait (%p1299_p12), [#allocation8], 512  }
  0x6c   : > { %956 = vsyncadd (%p1299_p12), [#allocation8], 4294966784  ;;  %v990_v0 = vmov 0.0   ;;  %vm991_vm0 = vmmov 0   ;;  %v805_v1 = vld [vmem:[#allocation9] sm:$0xff]   ;;  %v806_v2 = vld [vmem:[#allocation9 + $0x8] sm:$0xff]   ;;  %v489_v9 = vlaneseq }
  0x6d   : > { %710 = vmatprep.subr.bf16.mxu1 %v990_v0  ;;  %714 = vmatprep.mubr.msk.bf16.mxu1 %vm991_vm0, %v990_v0  ;;  %v355_v3 = vld [vmem:[%s297_s17] sm:$0xf]  ;;  %v807_v5 = vld [vmem:[#allocation7] sm:$0xff]   ;;  %v808_v7 = vld [vmem:[#allocation7 + $0x8] sm:$0xff]   ;;  %vm376_vm1 = vcmask 261120   ;;  %s684_s30 = sshll.u32 %s1208_s13, 3 }
  0x6e   : > { %702 = vmatprep.subr.bf16.mxu0 %v990_v0  ;;  %706 = vmatprep.mubr.msk.bf16.mxu0 %vm991_vm0, %v990_v0  ;;  %v356_v4 = vunpack.c.l.bf16 %v355_v3  ;;  %v490_v10 = vshrl.u32 %v489_v9, 7  ;;  %v487_v12 = vld [vmem:[%s1283_s3] sm:$0x3]  ;;  %s693_s9 = sshll.u32 %s975_s21, 7  ;;  %s338_s11 = scalar_lea.vmem [#allocation10], %s684_s30 }
  0x6f   : > { %711 = vmatpush3.bf16.msra.mxu1 %v805_v1  ;;  %703 = vmatpush3.bf16.msra.mxu0 %v807_v5  ;;  %v691_v29 = vld [vmem:[%s1284_s4] ss:$0 sm:$0xff]  ;;  %s533_s15 = sshll.u32 %s338_s11, 4  ;;  %s1231_s10 = scalar_lea.hbm %s1285_s5, %s693_s9  ;;  %s1233_s15 = int_to_ptr.vmem [resolvable:$true] %s533_s15 }
  0x70   : > { %712 = vmatprep.subr.bf16.mxu1 %v990_v0  ;;  %v357_v6 = vmul.f32 %v356_v4, %v356_v4  ;;  %704 = vmatprep.subr.bf16.mxu0 %v990_v0  ;;  %v497_v11 = vsub.s32 1, %v490_v10  ;;  %v491_v24 = vsub.s32 0, %v490_v10  ;;  %s519_s25 = scalar_lea.sflag [#allocation6], %s1208_s13  ;;  %s897_s16 = scalar_lea.vmem %s1233_s15, 128 }
  0x71   : > { %p898_p8 = scmp.ne.s32.totalorder %s1233_s15, %s897_s16  ;;  %p1300_p2 = scmp.ne.s32.totalorder %s1296_s8, 0 }
  0x72   : > { %v358_v8 = vpack.c.bf16 %v357_v6, %v357_v6  ;;  %v498_v13 = vrot.slane %v487_v12, %v497_v11  ;;  %v492_v25 = vrot.slane %v487_v12, %v491_v24  ;;  %s992_s21 = smov [#allocation10]  }
  0x73   : > { %713 = vmatpush3.bf16.msra.mxu1 %v806_v2  ;;  %705 = vmatpush3.bf16.msra.mxu0 %v808_v7  ;;  %p899_p1 = pnand %p898_p8, %p1300_p2  ;;  %s901_s17 = sshll.u32 %s992_s21, 4  ;;  %s902_s17 = int_to_ptr.vmem [resolvable:$false] %s901_s17 }
  0x74   : > { %s903_s26 = scalar_lea.vmem %s902_s17, 256  ;;  %p904_p3 = scmp.lt.s32.totalorder %s1233_s15, %s902_s17 }
  0x75   : > { %p900_p10 = pneg %p899_p1  ;;  %p905_p5 = scmp.lt.s32.totalorder %s903_s26, %s897_s16 }
  0x76   : > { %715 = vmatmul.mubr.msk.bf16.vlgmr.msra.gmra.mrb[0].mxu1 %vm376_vm1, %v358_v8  ;;  %707 = vmatmul.mubr.msk.bf16.vlgmr.msra.gmra.mrb[0].mxu0 %vm376_vm1, %v355_v3 }
  0x77   : > { %p906_p9 = por %p905_p5, %p904_p3 }
  0x79   : > { %p907_p11 = pnand %p906_p9, %p900_p10 }
 0x149   : > { %v476_v14 = vpop.f32.mrb[0].mxu1  ;;  %v414_v20 = vpop.f32.mrb[0].mxu0 }
 0x14a   : > { %v499_v15 = vadd.f32 %v498_v13, %v476_v14  ;;  %v716_v16 = vpop.f32.mrb[1].mxu1  ;;  %v708_v21 = vpop.f32.mrb[1].mxu0  ;;  %v493_v30 = vadd.f32 %v492_v25, %v414_v20 }
 0x14b   : > { %v479_v17 = vpop.f32.mrb[2].mxu1  ;;  %v417_v22 = vpop.f32.mrb[2].mxu0 }
 0x14c   : > { %v500_v18 = vmax.f32 %v499_v15, 0.0  ;;  %v717_v19 = vpop.f32.mrb[3].mxu1  ;;  %v709_v23 = vpop.f32.mrb[3].mxu0 }
 0x14e   : > { %809 = vrsqrt.f32 %v500_v18  ;;  %vm503_vm2 = vcmp.eq.f32.partialorder %v500_v18, inf  ;;  %v506_v28 = vand.u32 2147483648, %v500_v18  ;;  %vm505_vm3 = vcmp.eq.f32.partialorder %v500_v18, 0.0 }
 0x158   : > { %v810_v26 = vpop.eup %809 }
 0x159   : > { %v502_v27 = vmul.f32 %v810_v26, %v500_v18 }
 0x15b   : > { %v504_v31 = vsel %vm503_vm2, %v500_v18, %v502_v27 }
 0x15c   : > { %v507_v32 = vsel %vm505_vm3, %v506_v28, %v504_v31 }
 0x15d   : > { %v515_v33 = vmul.f32 %v691_v29, %v507_v32 }
 0x15f   : > { %v516_v34 = vadd.f32 %v515_v33, %v493_v30 }
 0x161   : > { %517 = vst [vmem:[%s338_s11] sm:$0xff] %v516_v34 }
 0x162   : > { %910 = shalt.err (!%p907_p11)
}
 0x163   : > { %s911_s13 = scalar_lea.hbm %s1231_s10, 128  ;;  %s915_s24 = scalar_lea.hbm %s1285_s5, 256 }
 0x164   : > { %p912_p0 = scmp.ne.s32.totalorder %s1231_s10, %s911_s13  ;;  %p916_p6 = scmp.lt.u32.totalorder %s1231_s10, %s1285_s5 }
 0x165   : > { %p917_p7 = scmp.lt.u32.totalorder %s915_s24, %s911_s13  ;;  %p919_p8 = scmp.lt.u32.totalorder %s911_s13, %s1231_s10 }
 0x166   : > { %p913_p4 = pnand %p912_p0, %p1300_p2 }
 0x167   : > { %p918_p12 = por %p917_p7, %p916_p6 }
 0x168   : > { %p914_p13 = pneg %p913_p4 }
 0x169   : > { %p920_p1 = por %p919_p8, %p918_p12 }
 0x16b   : > { %p921_p10 = pnand %p920_p1, %p914_p13 }
 0x16d   : > { %924 = shalt.err (!%p921_p10)
}
 0x16e   : > { %728 = dma.vmem_to_hbm [thread:$0]  (%p1300_p2), %s1233_s15, 128, %s1231_s10, %s519_s25  }
 0x16f PF: > { %s545_s11 = sand.u32 1, %s963_s18   ;;  %p1301_p3 = scmp.ne.s32.totalorder %s1293_s29, 0 }
 0x170   : > { %p1302_p5 = scmp.ge.s32.totalorder %s983_s23, 2  ;;  %s546_s27 = scalar_lea.sflag [#allocation6], %s545_s11 }
 0x172   : > { %p742_p9 = pnand %p1302_p5, %p1301_p3 }
 0x174   : > { %958 = dma.done.wait (!%p742_p9), %s546_s27, 128  }
 0x175   : > { %960 = vsyncadd (!%p742_p9), %s546_s27, 4294967168  ;;  %s22_s23 = sadd.s32 1, %s983_s23   ;;  %s1303_s18 = smov %s967_s19 }
 0x176   : > { %p19_p11 = scmp.ge.s32.totalorder %s22_s23, 4   ;;  %s1304_s19 = smov %s971_s20 }
 0x177   : > { %s1305_s20 = smov %s1165_s6  ;;  %s1306_s21 = smov %s979_s22 }
 0x178   : > { %s1307_s22 = smov %s1309_s12  ;;  %21 = sbr.rel (!%p19_p11) target bundleno = 7 (0x7), region = 109 }
 0x17f   :  { %551 = vsyncpa [#allocation5], 1 }
 0x180   :  { %553 = vsyncpa [#allocation5 + $0x1], 1 }
 0x181   :  { %554 = vsyncpa [#allocation8], 1 }
 0x182   :  { %555 = vsyncpa [#allocation6], 1 }
 0x183   :  { %557 = vsyncpa [#allocation6 + $0x1], 1 }

</bundles_post_ra>
